<compile_context>
chip_gen: v7x
topology: tpu7x:2x2x1
jax: 0.10.0
libtpu: 0.0.40
codegen_flags: <defaults>
</compile_context>

<pallas_src>
import math

import jax
import jax.numpy as jnp
from jax.experimental import pallas as pl
from jax.experimental.pallas import tpu as pltpu

HIDDEN = 32
LANES = 128


def _round_up(x, m):
    return ((x + m - 1) // m) * m


def _pack_factor(*dims, lanes=LANES, cap=LANES):
    """Smallest G such that G*d is a multiple of `lanes` for every d; falls back to 1."""
    g = 1
    for d in dims:
        g = math.lcm(g, lanes // math.gcd(lanes, d))
    return g if g <= cap else 1


def node_embedding_kernel(alpha_ref, x_ref, w1_ref, b1_ref, w2_ref, b2_ref, o_ref):
    # x_ref : (bm, G*in)    f32   (bf16 cast happens here, in VMEM -> no extra HBM pass)
    # w1_ref: (G*in, G*32)  bf16  block-diagonal (G copies of W1)
    # b1_ref: (1, G*32)     f32   b1 tiled G times
    # w2_ref: (G*32, G*out) bf16  block-diagonal (G copies of W2)
    # b2_ref: (1, G*out)    f32   b2 tiled G times
    # o_ref : (bm, G*out)   f32   lane-dense (G*out is a multiple of 128)
    x = x_ref[...].astype(jnp.bfloat16)
    h = jnp.dot(x, w1_ref[...], preferred_element_type=jnp.float32)
    h = h + b1_ref[...]                       # bias add on the f32 accumulator
    alpha = alpha_ref[0]                      # PReLU slope (scalar, SMEM)
    h = jnp.where(h > 0, h, alpha * h)        # PReLU in f32 (VPU)
    # Dropout: identity in eval mode.
    out = jnp.dot(h.astype(jnp.bfloat16), w2_ref[...],
                  preferred_element_type=jnp.float32)
    o_ref[...] = (out + b2_ref[...]).astype(o_ref.dtype)


def node_embedding(data, w1, b1, alpha, w2, b2, *, bm=1024):
    n, in_features = data.shape
    out_features = w2.shape[1]

    # Lane-packing factor (in=16, hidden=32, out=8 -> G=16).
    G = _pack_factor(in_features, HIDDEN, out_features)

    # --- parameters: block-diagonal weights (kron(I_G, W)), tiled biases. Built once. ---
    eye = jnp.eye(G, dtype=jnp.bfloat16)
    w1_bd = jnp.kron(eye, w1.astype(jnp.bfloat16))   # (G*in,  G*32)  bf16, ~VMEM-resident
    w2_bd = jnp.kron(eye, w2.astype(jnp.bfloat16))   # (G*32,  G*out) bf16
    b1_p = jnp.tile(jnp.asarray(b1, jnp.float32).reshape(1, HIDDEN), (1, G))
    b2_p = jnp.tile(jnp.asarray(b2, jnp.float32).reshape(1, out_features), (1, G))
    alpha_f = jnp.asarray(alpha, jnp.float32).reshape(1)

    # --- pack x: (n, in) -> (n_groups, G*in).  Reshape of a contiguous f32 array is
    # metadata-only.  Only a <G-row tail pad when n % G != 0 (no full-tile padding).
    if n % G:
        data = jnp.pad(data, ((0, G - n % G), (0, 0)))
    n_groups = data.shape[0] // G
    x_packed = data.reshape(n_groups, G * in_features)   # stays f32 in HBM

    # --- row tile over packed rows.  grid = cdiv; Pallas masks the ragged last block's
    # output writes, so no padding to a tile multiple.  Keep >= 2 grid steps when the
    # input is large enough (feeds both v7x TensorCores via the "parallel" axis).
    if n_groups <= 8:
        bm_eff = n_groups                      # single block == full dim (always legal)
    else:
        bm_eff = max(8, min(bm, _round_up(pl.cdiv(n_groups, 2), 8)))
    grid = (pl.cdiv(n_groups, bm_eff),)

    # VMEM @ bm=1024, G=16: x 1 MiB + out 0.5 MiB (double-buffered) + weights ~0.4 MiB +
    # f32 h temporaries ~3 MiB -> well under every generation's scoped VMEM default.
    out_packed = pl.pallas_call(
        node_embedding_kernel,
        out_shape=jax.ShapeDtypeStruct((n_groups, G * out_features), jnp.float32),
        grid_spec=pltpu.PrefetchScalarGridSpec(
            num_scalar_prefetch=0,
            grid=grid,
            in_specs=[
                # PReLU slope lives in SMEM (scalar).
                pl.BlockSpec(memory_space=pltpu.MemorySpace.SMEM),
                # Packed node rows: lane-dense f32 stream, large row tile.
                pl.BlockSpec((bm_eff, G * in_features), lambda i: (i, 0)),
                # Weights / biases: constant block index -> VMEM-resident, DMA'd once.
                pl.BlockSpec((G * in_features, G * HIDDEN), lambda i: (0, 0)),
                pl.BlockSpec((1, G * HIDDEN), lambda i: (0, 0)),
                pl.BlockSpec((G * HIDDEN, G * out_features), lambda i: (0, 0)),
                pl.BlockSpec((1, G * out_features), lambda i: (0, 0)),
            ],
            # Lane-dense output (G*out = 128 lanes) -> unmasked full-width stores.
            out_specs=pl.BlockSpec((bm_eff, G * out_features), lambda i: (i, 0)),
        ),
        compiler_params=pltpu.CompilerParams(
            dimension_semantics=("parallel",)),
    )(alpha_f, x_packed, w1_bd, b1_p, w2_bd, b2_p)

    # Unpack: metadata-only reshape, then slice off the (<G) tail pad rows.
    out = out_packed.reshape(n_groups * G, out_features)
    return out[:n]


def reference(data, w1, b1, alpha, w2, b2):
    # Mirror the kernel's mixed precision: bf16 matmul inputs, f32 accumulation/elementwise.
    hp = jax.lax.Precision.HIGHEST
    xf = data.astype(jnp.bfloat16).astype(jnp.float32)
    w1f = w1.astype(jnp.bfloat16).astype(jnp.float32)
    w2f = w2.astype(jnp.bfloat16).astype(jnp.float32)
    h = jnp.dot(xf, w1f, precision=hp) + b1
    h = jnp.where(h > 0, h, alpha[0] * h)
    h = h.astype(jnp.bfloat16).astype(jnp.float32)
    return jnp.dot(h, w2f, precision=hp) + b2


if __name__ == "__main__":
    key = jax.random.PRNGKey(0)
    N = 20              # ragged on purpose: exercises the tail-pad + edge-block path
    IN_FEATURES = 16
    OUT_FEATURES = 8

    k_x, k_w1, k_b1, k_w2, k_b2 = jax.random.split(key, 5)

    data = jax.random.normal(k_x, (N, IN_FEATURES), dtype=jnp.float32)

    # Deterministic parameter init (Kaiming-uniform-ish bounds, like nn.Linear defaults).
    lim1 = 1.0 / jnp.sqrt(IN_FEATURES)
    w1 = jax.random.uniform(k_w1, (IN_FEATURES, HIDDEN), jnp.float32, -lim1, lim1)
    b1 = jax.random.uniform(k_b1, (1, HIDDEN), jnp.float32, -lim1, lim1)

    lim2 = 1.0 / jnp.sqrt(HIDDEN)
    w2 = jax.random.uniform(k_w2, (HIDDEN, OUT_FEATURES), jnp.float32, -lim2, lim2)
    b2 = jax.random.uniform(k_b2, (1, OUT_FEATURES), jnp.float32, -lim2, lim2)

    alpha = jnp.array([0.25], dtype=jnp.float32)   # PReLU default init

    out = node_embedding(data, w1, b1, alpha, w2, b2)
    out = jax.block_until_ready(out)

    ref = reference(data, w1, b1, alpha, w2, b2)
    assert out.shape == (N, OUT_FEATURES)
    assert jnp.allclose(out, ref, atol=2e-4, rtol=2e-4)

    print("KERNEL_OK")
</pallas_src>

<mosaic_0001>
module attributes {stable_mosaic.version = 11 : i64} {
  func.func @node_embedding_kernel(%arg0: i32, %arg1: memref<1xf32, #tpu.memory_space<smem>>, %arg2: memref<2x256xf32, #tpu.memory_space<vmem>>, %arg3: memref<256x512xbf16, #tpu.memory_space<vmem>>, %arg4: memref<1x512xf32, #tpu.memory_space<vmem>>, %arg5: memref<512x128xbf16, #tpu.memory_space<vmem>>, %arg6: memref<1x128xf32, #tpu.memory_space<vmem>>, %arg7: memref<2x128xf32, #tpu.memory_space<vmem>>) attributes {dimension_semantics = [#tpu.dimension_semantics<parallel>], iteration_bounds = array<i64: 1>, scalar_prefetch = 0 : i64, scratch_operands = 0 : i64, tpu.core_type = #tpu.core_type<tc>, window_params = [{transform_indices = @transform_0, window_bounds = array<i64: 1>}, {transform_indices = @transform_1, window_bounds = array<i64: 2, 256>}, {pipeline_mode = #tpu.pipeline_mode<synchronous>, transform_indices = @transform_2, window_bounds = array<i64: 256, 512>}, {pipeline_mode = #tpu.pipeline_mode<synchronous>, transform_indices = @transform_3, window_bounds = array<i64: 1, 512>}, {pipeline_mode = #tpu.pipeline_mode<synchronous>, transform_indices = @transform_4, window_bounds = array<i64: 512, 128>}, {pipeline_mode = #tpu.pipeline_mode<synchronous>, transform_indices = @transform_5, window_bounds = array<i64: 1, 128>}, {transform_indices = @transform_6, window_bounds = array<i64: 2, 128>}]} {
    %c0 = arith.constant 0 : index
    %c0_0 = arith.constant 0 : index
    %0 = vector.load %arg2[%c0, %c0_0] : memref<2x256xf32, #tpu.memory_space<vmem>>, vector<2x256xf32>
    %1 = arith.truncf %0 : vector<2x256xf32> to vector<2x256xbf16>
    %c0_1 = arith.constant 0 : index
    %c0_2 = arith.constant 0 : index
    %2 = vector.load %arg3[%c0_1, %c0_2] : memref<256x512xbf16, #tpu.memory_space<vmem>>, vector<256x512xbf16>
    %cst = arith.constant dense<0.000000e+00> : vector<2x512xf32>
    %3 = tpu.matmul %1, %2, %cst {dimension_numbers = #tpu.dot_dimension_numbers<[1], [0], [0], [1], [0, 0, 1, 1], [], []>} : vector<2x256xbf16>, vector<256x512xbf16>, vector<2x512xf32> -> vector<2x512xf32>
    %c0_3 = arith.constant 0 : index
    %c0_4 = arith.constant 0 : index
    %4 = vector.load %arg4[%c0_3, %c0_4] : memref<1x512xf32, #tpu.memory_space<vmem>>, vector<1x512xf32>
    %5 = vector.broadcast %4 : vector<1x512xf32> to vector<2x512xf32>
    %6 = arith.addf %3, %5 : vector<2x512xf32>
    %c0_5 = arith.constant 0 : index
    %7 = memref.load %arg1[%c0_5] : memref<1xf32, #tpu.memory_space<smem>>
    %cst_6 = arith.constant 0.000000e+00 : f32
    %8 = vector.broadcast %cst_6 : f32 to vector<2x512xf32>
    %9 = arith.cmpf ogt, %6, %8 : vector<2x512xf32>
    %10 = vector.broadcast %7 : f32 to vector<2x512xf32>
    %11 = arith.mulf %10, %6 : vector<2x512xf32>
    %12 = arith.select %9, %6, %11 : vector<2x512xi1>, vector<2x512xf32>
    %13 = arith.truncf %12 : vector<2x512xf32> to vector<2x512xbf16>
    %c0_7 = arith.constant 0 : index
    %c0_8 = arith.constant 0 : index
    %14 = vector.load %arg5[%c0_7, %c0_8] : memref<512x128xbf16, #tpu.memory_space<vmem>>, vector<512x128xbf16>
    %cst_9 = arith.constant dense<0.000000e+00> : vector<2x128xf32>
    %15 = tpu.matmul %13, %14, %cst_9 {dimension_numbers = #tpu.dot_dimension_numbers<[1], [0], [0], [1], [0, 0, 1, 1], [], []>} : vector<2x512xbf16>, vector<512x128xbf16>, vector<2x128xf32> -> vector<2x128xf32>
    %c0_10 = arith.constant 0 : index
    %c0_11 = arith.constant 0 : index
    %16 = vector.load %arg6[%c0_10, %c0_11] : memref<1x128xf32, #tpu.memory_space<vmem>>, vector<1x128xf32>
    %17 = vector.broadcast %16 : vector<1x128xf32> to vector<2x128xf32>
    %18 = arith.addf %15, %17 : vector<2x128xf32>
    %c0_12 = arith.constant 0 : index
    %c0_13 = arith.constant 0 : index
    %19 = vector.load %arg7[%c0_12, %c0_13] : memref<2x128xf32, #tpu.memory_space<vmem>>, vector<2x128xf32>
    tpu.vector_store %arg7[%c0_12, %c0_13], %18 {strides = array<i32>} : memref<2x128xf32, #tpu.memory_space<vmem>>, vector<2x128xf32>,
    return
  }
  func.func @transform_0(%arg0: i32) -> i32 {
    %c0_i32 = arith.constant 0 : i32
    %c0_i32_0 = arith.constant 0 : i32
    return %c0_i32 : i32
  }
  func.func @transform_1(%arg0: i32) -> (i32, i32) {
    %c0_i32 = arith.constant 0 : i32
    %c0_i32_0 = arith.constant 0 : i32
    return %arg0, %c0_i32 : i32, i32
  }
  func.func @transform_2(%arg0: i32) -> (i32, i32) {
    %c0_i32 = arith.constant 0 : i32
    %c0_i32_0 = arith.constant 0 : i32
    %c0_i32_1 = arith.constant 0 : i32
    return %c0_i32, %c0_i32_0 : i32, i32
  }
  func.func @transform_3(%arg0: i32) -> (i32, i32) {
    %c0_i32 = arith.constant 0 : i32
    %c0_i32_0 = arith.constant 0 : i32
    %c0_i32_1 = arith.constant 0 : i32
    return %c0_i32, %c0_i32_0 : i32, i32
  }
  func.func @transform_4(%arg0: i32) -> (i32, i32) {
    %c0_i32 = arith.constant 0 : i32
    %c0_i32_0 = arith.constant 0 : i32
    %c0_i32_1 = arith.constant 0 : i32
    return %c0_i32, %c0_i32_0 : i32, i32
  }
  func.func @transform_5(%arg0: i32) -> (i32, i32) {
    %c0_i32 = arith.constant 0 : i32
    %c0_i32_0 = arith.constant 0 : i32
    %c0_i32_1 = arith.constant 0 : i32
    return %c0_i32, %c0_i32_0 : i32, i32
  }
  func.func @transform_6(%arg0: i32) -> (i32, i32) {
    %c0_i32 = arith.constant 0 : i32
    %c0_i32_0 = arith.constant 0 : i32
    return %arg0, %c0_i32 : i32, i32
  }
}

</mosaic_0001>

<bundles_post_ra>
// kernel: tpu_custom_call.1
= control target key start
LH: loop header
LB: loop body
LE: loop exit
PB: predicated region body
PF: predicated region fallthrough
CT: control target
= control target key end

     0   :  { %12 = vsyncpa [#allocation4], 0  ;;  %s1417_s0 = inlined_call_operand.<no memory space> [shape: f32[1], index: 0, kind: input, shape index: {}]   ;;  %s1418_s1 = inlined_call_operand.hbm [shape: f32[2,256], index: 1, kind: input, shape index: {}]   ;;  %s1419_s2 = inlined_call_operand.hbm [shape: bf16[256,512], index: 2, kind: input, shape index: {}]   ;;  %s1420_s3 = inlined_call_operand.vmem [shape: f32[1,512], index: 3, kind: input, shape index: {}]   ;;  %s1421_s4 = inlined_call_operand.hbm [shape: bf16[512,128], index: 4, kind: input, shape index: {}]   ;;  %s1422_s5 = inlined_call_operand.vmem [shape: f32[1,128], index: 5, kind: input, shape index: {}]   ;;  %s1423_s6 = inlined_call_operand.hbm [shape: f32[2,128], index: 6, kind: output, shape index: {}]  }
   0x1   :  { %13 = vsyncpa [#allocation7], 0 }
   0x2   :  { %14 = vsyncpa [#allocation5], 0  ;;  %s1317_s21 = smov [#allocation6]   ;;  %s1223_s25 = scalar_lea.hbm %s1419_s2, 8192 }
   0x3   :  { %s32_s22 = sshll.u32 %s1317_s21, 4  ;;  %p1224_p0 = scmp.ne.s32.totalorder %s1419_s2, %s1223_s25  ;;  %s33_s22 = int_to_ptr.vmem [resolvable:$true] %s32_s22 }
   0x4   :  { %p1227_p1 = scmp.lt.u32.totalorder %s1223_s25, %s1419_s2 }
   0x6   :  { %p1229_p2 = pnand %p1227_p1, %p1224_p0 }
   0x8   :  { %1232 = shalt.err (!%p1229_p2)
}
   0x9   :  { %s1233_s30 = scalar_lea.vmem %s33_s22, 8192  ;;  %p1238_p4 = scmp.lt.s32.totalorder %s33_s22, %s33_s22 }
   0xa   :  { %p1234_p3 = scmp.ne.s32.totalorder %s33_s22, %s1233_s30  ;;  %p1239_p5 = scmp.lt.s32.totalorder %s1233_s30, %s1233_s30 }
   0xc   :  { %p1240_p6 = por %p1239_p5, %p1238_p4 }
   0xe   :  { %p1241_p7 = pnand %p1240_p6, %p1234_p3 }
  0x10   :  { %1244 = shalt.err (!%p1241_p7)
}
  0x11   :  { %s1318_s7 = smov 256   ;;  %s1319_s8 = smov 16  }
  0x12   :  { %38 = dma.hbm_to_vmem [thread:$0]  %s1419_s2, 8192, %s33_s22, [#allocation7], %s1318_s7, %s1318_s7, %s1319_s8  }
  0x13   :  { %s1320_s11 = smov [#allocation3]   ;;  %s1321_s13 = smov [#allocation8]  }
  0x14   :  { %s23_s12 = sshll.u32 %s1320_s11, 4  ;;  %s46_s14 = sshll.u32 %s1321_s13, 4  ;;  %s24_s12 = int_to_ptr.vmem [resolvable:$true] %s23_s12  ;;  %s47_s14 = int_to_ptr.vmem [resolvable:$true] %s46_s14 }
  0x15   :  { %s1245_s17 = scalar_lea.hbm %s1418_s1, 64 }
  0x16   :  { %p1246_p8 = scmp.ne.s32.totalorder %s1418_s1, %s1245_s17  ;;  %p1249_p9 = scmp.lt.u32.totalorder %s1245_s17, %s1418_s1 }
  0x18   :  { %p1251_p10 = pnand %p1249_p9, %p1246_p8 }
  0x1a   :  { %1254 = shalt.err (!%p1251_p10)
}
  0x1b   :  { %s1255_s2 = scalar_lea.vmem %s24_s12, 64  ;;  %p1260_p12 = scmp.lt.s32.totalorder %s24_s12, %s24_s12 }
  0x1c   :  { %p1256_p11 = scmp.ne.s32.totalorder %s24_s12, %s1255_s2  ;;  %p1261_p13 = scmp.lt.s32.totalorder %s1255_s2, %s1255_s2 }
  0x1e   :  { %p1262_p0 = por %p1261_p13, %p1260_p12 }
  0x20   :  { %p1263_p1 = pnand %p1262_p0, %p1256_p11 }
  0x22   :  { %1266 = shalt.err (!%p1263_p1)
}
  0x23   :  { %26 = dma.hbm_to_vmem [thread:$0]  %s1418_s1, 64, %s24_s12, [#allocation4]  }
  0x24   :  { %s1267_s26 = scalar_lea.hbm %s1421_s4, 4096 }
  0x25   :  { %p1268_p2 = scmp.ne.s32.totalorder %s1421_s4, %s1267_s26  ;;  %p1271_p3 = scmp.lt.u32.totalorder %s1267_s26, %s1421_s4 }
  0x27   :  { %p1273_p4 = pnand %p1271_p3, %p1268_p2 }
  0x29   :  { %1276 = shalt.err (!%p1273_p4)
}
  0x2a   :  { %s1277_s7 = scalar_lea.vmem %s47_s14, 4096  ;;  %p1282_p6 = scmp.lt.s32.totalorder %s47_s14, %s47_s14 }
  0x2b   :  { %p1278_p5 = scmp.ne.s32.totalorder %s47_s14, %s1277_s7  ;;  %p1283_p7 = scmp.lt.s32.totalorder %s1277_s7, %s1277_s7 }
  0x2d   :  { %p1284_p8 = por %p1283_p7, %p1282_p6 }
  0x2f   :  { %p1285_p9 = pnand %p1284_p8, %p1278_p5 }
  0x31   :  { %1288 = shalt.err (!%p1285_p9)
}
  0x32   :  { %s1322_s1 = smov 64   ;;  %s1323_s8 = smov 4  }
  0x33   :  { %52 = dma.hbm_to_vmem [thread:$0]  %s1421_s4, 4096, %s47_s14, [#allocation7], %s1322_s1, %s1322_s1, %s1323_s8  }
  0x34   :  { %1311 = dma.done.wait [#allocation4], 64  }
  0x35   :  { %1312 = vsyncadd [#allocation4], 4294967232 }
  0x36   :  { %1313 = dma.done.wait [#allocation7], 12288  }
  0x37   :  { %1314 = vsyncadd [#allocation7], 4294955008  ;;  %v1095_v0 = vld [vmem:[#allocation6 + $0x4] ss:$16 sps:$4 sm:$0xff]   ;;  %v1097_v1 = vld [vmem:[#allocation6 + $0xc] ss:$16 sps:$4 sm:$0xff]  }
  0x38   :  { %485 = vmatprep.subr.bf16.mxu0 %v1095_v0  ;;  %v1099_v2 = vld [vmem:[#allocation6] ss:$16 sps:$4 sm:$0xff]   ;;  %v1100_v3 = vld [vmem:[#allocation6 + $0x8] ss:$16 sps:$4 sm:$0xff]   ;;  %526 = vmatprep.subr.bf16.mxu1 %v1097_v1  ;;  %v1101_v4 = vld [vmem:[#allocation6 + $0x24] ss:$16 sps:$4 sm:$0xff]  }
  0x39   :  { %486 = vmatpush1.bf16.msra.mxu0 %v1099_v2  ;;  %527 = vmatpush1.bf16.msra.mxu1 %v1100_v3  ;;  %v1103_v5 = vld [vmem:[#allocation6 + $0x2c] ss:$16 sps:$4 sm:$0xff]   ;;  %v1105_v6 = vld [vmem:[#allocation6 + $0x20] ss:$16 sps:$4 sm:$0xff]   ;;  %v1106_v7 = vld [vmem:[#allocation6 + $0x28] ss:$16 sps:$4 sm:$0xff]  }
  0x3a   :  { %487 = vmatprep.subr.bf16.mxu0 %v1101_v4  ;;  %528 = vmatprep.subr.bf16.mxu1 %v1103_v5  ;;  %v1107_v8 = vld [vmem:[#allocation6 + $0x44] ss:$16 sps:$4 sm:$0xff]   ;;  %v1109_v9 = vld [vmem:[#allocation6 + $0x4c] ss:$16 sps:$4 sm:$0xff]   ;;  %v1111_v10 = vld [vmem:[#allocation6 + $0x40] ss:$16 sps:$4 sm:$0xff]  }
  0x3b   :  { %v1112_v11 = vld [vmem:[#allocation6 + $0x48] ss:$16 sps:$4 sm:$0xff]   ;;  %v1113_v12 = vld [vmem:[#allocation6 + $0x64] ss:$16 sps:$4 sm:$0xff]   ;;  %v1115_v13 = vld [vmem:[#allocation6 + $0x6c] ss:$16 sps:$4 sm:$0xff]  }
  0x3c   :  { %v1117_v14 = vld [vmem:[#allocation6 + $0x60] ss:$16 sps:$4 sm:$0xff]   ;;  %v1118_v15 = vld [vmem:[#allocation6 + $0x68] ss:$16 sps:$4 sm:$0xff]   ;;  %v1119_v16 = vld [vmem:[#allocation6 + $0x84] ss:$16 sps:$4 sm:$0xff]  }
  0x3d   :  { %488 = vmatpush1.bf16.msra.mxu0 %v1105_v6  ;;  %529 = vmatpush1.bf16.msra.mxu1 %v1106_v7  ;;  %v1121_v17 = vld [vmem:[#allocation6 + $0x8c] ss:$16 sps:$4 sm:$0xff]   ;;  %v1123_v18 = vld [vmem:[#allocation6 + $0x80] ss:$16 sps:$4 sm:$0xff]   ;;  %v1124_v19 = vld [vmem:[#allocation6 + $0x88] ss:$16 sps:$4 sm:$0xff]  }
  0x3e   :  { %489 = vmatprep.subr.bf16.mxu0 %v1107_v8  ;;  %530 = vmatprep.subr.bf16.mxu1 %v1109_v9  ;;  %v1125_v20 = vld [vmem:[#allocation6 + $0xa4] ss:$16 sps:$4 sm:$0xff]   ;;  %v1127_v21 = vld [vmem:[#allocation6 + $0xac] ss:$16 sps:$4 sm:$0xff]   ;;  %v1129_v22 = vld [vmem:[#allocation6 + $0xa0] ss:$16 sps:$4 sm:$0xff]  }
  0x3f   :  { %v1130_v23 = vld [vmem:[#allocation6 + $0xa8] ss:$16 sps:$4 sm:$0xff]   ;;  %v1131_v24 = vld [vmem:[#allocation6 + $0xc4] ss:$16 sps:$4 sm:$0xff]   ;;  %v1133_v25 = vld [vmem:[#allocation6 + $0xcc] ss:$16 sps:$4 sm:$0xff]  }
  0x40   :  { %v1135_v26 = vld [vmem:[#allocation6 + $0xc0] ss:$16 sps:$4 sm:$0xff]   ;;  %v1136_v27 = vld [vmem:[#allocation6 + $0xc8] ss:$16 sps:$4 sm:$0xff]   ;;  %v1137_v28 = vld [vmem:[#allocation6 + $0xe4] ss:$16 sps:$4 sm:$0xff]  }
  0x41   :  { %490 = vmatpush1.bf16.msra.mxu0 %v1111_v10  ;;  %531 = vmatpush1.bf16.msra.mxu1 %v1112_v11  ;;  %v1139_v29 = vld [vmem:[#allocation6 + $0xec] ss:$16 sps:$4 sm:$0xff]   ;;  %v1141_v30 = vld [vmem:[#allocation6 + $0xe0] ss:$16 sps:$4 sm:$0xff]   ;;  %v1142_v31 = vld [vmem:[#allocation6 + $0xe8] ss:$16 sps:$4 sm:$0xff]  }
  0x42   :  { %491 = vmatprep.subr.bf16.mxu0 %v1113_v12  ;;  %532 = vmatprep.subr.bf16.mxu1 %v1115_v13  ;;  %v1143_v32 = vld [vmem:[#allocation6 + $0x104] ss:$16 sps:$4 sm:$0xff]   ;;  %v1145_v33 = vld [vmem:[#allocation6 + $0x10c] ss:$16 sps:$4 sm:$0xff]   ;;  %v1147_v34 = vld [vmem:[#allocation6 + $0x100] ss:$16 sps:$4 sm:$0xff]  }
  0x43   :  { %v1148_v35 = vld [vmem:[#allocation6 + $0x108] ss:$16 sps:$4 sm:$0xff]   ;;  %v1149_v36 = vld [vmem:[#allocation6 + $0x124] ss:$16 sps:$4 sm:$0xff]   ;;  %v1151_v37 = vld [vmem:[#allocation6 + $0x12c] ss:$16 sps:$4 sm:$0xff]  }
  0x44   :  { %v1153_v38 = vld [vmem:[#allocation6 + $0x120] ss:$16 sps:$4 sm:$0xff]   ;;  %v1154_v39 = vld [vmem:[#allocation6 + $0x128] ss:$16 sps:$4 sm:$0xff]   ;;  %v1155_v40 = vld [vmem:[#allocation6 + $0x144] ss:$16 sps:$4 sm:$0xff]  }
  0x45   :  { %492 = vmatpush1.bf16.msra.mxu0 %v1117_v14  ;;  %533 = vmatpush1.bf16.msra.mxu1 %v1118_v15  ;;  %v1157_v41 = vld [vmem:[#allocation6 + $0x14c] ss:$16 sps:$4 sm:$0xff]   ;;  %v1159_v42 = vld [vmem:[#allocation6 + $0x140] ss:$16 sps:$4 sm:$0xff]   ;;  %v1160_v43 = vld [vmem:[#allocation6 + $0x148] ss:$16 sps:$4 sm:$0xff]  }
  0x46   :  { %493 = vmatprep.subr.bf16.mxu0 %v1119_v16  ;;  %534 = vmatprep.subr.bf16.mxu1 %v1121_v17  ;;  %v1161_v44 = vld [vmem:[#allocation6 + $0x164] ss:$16 sps:$4 sm:$0xff]   ;;  %v1163_v45 = vld [vmem:[#allocation6 + $0x16c] ss:$16 sps:$4 sm:$0xff]   ;;  %v1165_v46 = vld [vmem:[#allocation6 + $0x160] ss:$16 sps:$4 sm:$0xff]  }
  0x47   :  { %v1166_v47 = vld [vmem:[#allocation6 + $0x168] ss:$16 sps:$4 sm:$0xff]   ;;  %v945_v48 = vld.sshfl [vmem:[#allocation3] sm:$0x33 pattern:$0x76325410] }
  0x48   :  { %v1167_v49 = vld [vmem:[#allocation6 + $0x184] ss:$16 sps:$4 sm:$0xff]   ;;  %v74_v50 = vcombine.high %v945_v48, %v945_v48  ;;  %v1169_v51 = vld [vmem:[#allocation6 + $0x18c] ss:$16 sps:$4 sm:$0xff]   ;;  %v1171_v52 = vld [vmem:[#allocation6 + $0x180] ss:$16 sps:$4 sm:$0xff]   ;;  %v77_v6 = vpack.c.bf16 %v945_v48, %v945_v48  ;;  %v572_v48 = vstv %s1417_s0 }
  0x49   :  { %494 = vmatpush1.bf16.msra.mxu0 %v1123_v18  ;;  %535 = vmatpush1.bf16.msra.mxu1 %v1124_v19  ;;  %v1172_v54 = vld [vmem:[#allocation6 + $0x188] ss:$16 sps:$4 sm:$0xff]   ;;  %v1173_v55 = vld [vmem:[#allocation6 + $0x1a4] ss:$16 sps:$4 sm:$0xff]   ;;  %v1175_v56 = vld [vmem:[#allocation6 + $0x1ac] ss:$16 sps:$4 sm:$0xff]  }
  0x4a   :  { %495 = vmatprep.subr.bf16.mxu0 %v1125_v20  ;;  %536 = vmatprep.subr.bf16.mxu1 %v1127_v21  ;;  %v78_v53 = vpack.c.bf16 %v74_v50, %v74_v50  ;;  %v1177_v57 = vld [vmem:[#allocation6 + $0x1a0] ss:$16 sps:$4 sm:$0xff]   ;;  %v1178_v58 = vld [vmem:[#allocation6 + $0x1a8] ss:$16 sps:$4 sm:$0xff]   ;;  %v1179_v59 = vld [vmem:[#allocation6 + $0x1c4] ss:$16 sps:$4 sm:$0xff]  }
  0x4b   :  { %v1181_v60 = vld [vmem:[#allocation6 + $0x1cc] ss:$16 sps:$4 sm:$0xff]   ;;  %v1183_v61 = vld [vmem:[#allocation6 + $0x1c0] ss:$16 sps:$4 sm:$0xff]   ;;  %v1184_v62 = vld [vmem:[#allocation6 + $0x1c8] ss:$16 sps:$4 sm:$0xff]  }
  0x4c   :  { %517 = vmatprep.mubr.bf16.mxu0 %v78_v53  ;;  %558 = vmatprep.mubr.bf16.mxu1 %v78_v53  ;;  %v1185_v63 = vld [vmem:[#allocation6 + $0x1e4] ss:$16 sps:$4 sm:$0xff]   ;;  %v1187_v0 = vld [vmem:[#allocation6 + $0x1ec] ss:$16 sps:$4 sm:$0xff]   ;;  %v1189_v1 = vld [vmem:[#allocation6 + $0x1e0] ss:$16 sps:$4 sm:$0xff]  }
  0x4d   :  { %496 = vmatpush1.bf16.msra.mxu0 %v1129_v22  ;;  %537 = vmatpush1.bf16.msra.mxu1 %v1130_v23  ;;  %v1190_v2 = vld [vmem:[#allocation6 + $0x1e8] ss:$16 sps:$4 sm:$0xff]   ;;  %v1191_v3 = vld [vmem:[#allocation8 + $0x40] sm:$0xff]   ;;  %v1199_v12 = vld [vmem:[#allocation8 + $0x50] sm:$0xff]   ;;  %s1324_s14 = smov [#allocation9]  }
  0x4e   :  { %497 = vmatprep.subr.bf16.mxu0 %v1131_v24  ;;  %538 = vmatprep.subr.bf16.mxu1 %v1133_v25  ;;  %v1192_v4 = vld [vmem:[#allocation8 + $0xc0] sm:$0xff]   ;;  %v1195_v8 = vld [vmem:[#allocation8 + $0x48] sm:$0xff]   ;;  %v1200_v13 = vld [vmem:[#allocation8 + $0xd0] sm:$0xff]   ;;  %s935_s15 = sshll.u32 %s1324_s14, 4  ;;  %s936_s15 = int_to_ptr.vmem [resolvable:$true] %s935_s15 }
  0x4f   :  { %v1193_v5 = vld [vmem:[#allocation8] sm:$0xff]   ;;  %v1196_v9 = vld [vmem:[#allocation8 + $0xc8] sm:$0xff]   ;;  %v1201_v14 = vld [vmem:[#allocation8 + $0x10] sm:$0xff]   ;;  %s1289_s16 = scalar_lea.vmem %s936_s15, 32  ;;  %p1294_p11 = scmp.lt.s32.totalorder %s936_s15, %s936_s15 }
  0x50   :  { %v1194_v7 = vld [vmem:[#allocation8 + $0x80] sm:$0xff]   ;;  %v1197_v10 = vld [vmem:[#allocation8 + $0x8] sm:$0xff]   ;;  %v1202_v15 = vld [vmem:[#allocation8 + $0x90] sm:$0xff]   ;;  %p1290_p10 = scmp.ne.s32.totalorder %s936_s15, %s1289_s16  ;;  %p1295_p12 = scmp.lt.s32.totalorder %s1289_s16, %s1289_s16 }
  0x51   :  { %498 = vmatpush1.bf16.msra.mxu0 %v1135_v26  ;;  %539 = vmatpush1.bf16.msra.mxu1 %v1136_v27  ;;  %v1198_v11 = vld [vmem:[#allocation8 + $0x88] sm:$0xff]   ;;  %v1203_v16 = vld [vmem:[#allocation8 + $0x58] sm:$0xff]   ;;  %v1207_v20 = vld [vmem:[#allocation8 + $0x60] sm:$0xff]  }
  0x52   :  { %499 = vmatprep.subr.bf16.mxu0 %v1137_v28  ;;  %540 = vmatprep.subr.bf16.mxu1 %v1139_v29  ;;  %v1204_v17 = vld [vmem:[#allocation8 + $0xd8] sm:$0xff]   ;;  %v1208_v21 = vld [vmem:[#allocation8 + $0xe0] sm:$0xff]   ;;  %v1211_v24 = vld [vmem:[#allocation8 + $0x68] sm:$0xff]   ;;  %p1296_p13 = por %p1295_p12, %p1294_p11 }
  0x53   :  { %v1205_v18 = vld [vmem:[#allocation8 + $0x18] sm:$0xff]   ;;  %v1209_v22 = vld [vmem:[#allocation8 + $0x20] sm:$0xff]   ;;  %v1212_v25 = vld [vmem:[#allocation8 + $0xe8] sm:$0xff]  }
  0x54   :  { %v1206_v19 = vld [vmem:[#allocation8 + $0x98] sm:$0xff]   ;;  %v1210_v23 = vld [vmem:[#allocation8 + $0xa0] sm:$0xff]   ;;  %v1213_v26 = vld [vmem:[#allocation8 + $0x28] sm:$0xff]   ;;  %p1297_p0 = pnand %p1296_p13, %p1290_p10 }
  0x55   :  { %500 = vmatpush1.bf16.msra.mxu0 %v1141_v30  ;;  %541 = vmatpush1.bf16.msra.mxu1 %v1142_v31  ;;  %v1214_v27 = vld [vmem:[#allocation8 + $0xa8] sm:$0xff]   ;;  %v1215_v28 = vld [vmem:[#allocation8 + $0x70] sm:$0xff]  }
  0x56   :  { %501 = vmatprep.subr.bf16.mxu0 %v1143_v32  ;;  %542 = vmatprep.subr.bf16.mxu1 %v1145_v33  ;;  %v1216_v29 = vld [vmem:[#allocation8 + $0xf0] sm:$0xff]   ;;  %v1219_v32 = vld [vmem:[#allocation8 + $0x78] sm:$0xff]  }
  0x57   :  { %v1217_v30 = vld [vmem:[#allocation8 + $0x30] sm:$0xff]   ;;  %v1220_v33 = vld [vmem:[#allocation8 + $0xf8] sm:$0xff]  }
  0x58   :  { %v1218_v31 = vld [vmem:[#allocation8 + $0xb0] sm:$0xff]  }
  0x59   :  { %502 = vmatpush1.bf16.msra.mxu0 %v1147_v34  ;;  %543 = vmatpush1.bf16.msra.mxu1 %v1148_v35  ;;  %v1221_v34 = vld [vmem:[#allocation8 + $0x38] sm:$0xff]  }
  0x5a   :  { %503 = vmatprep.subr.bf16.mxu0 %v1149_v36  ;;  %544 = vmatprep.subr.bf16.mxu1 %v1151_v37  ;;  %v1222_v35 = vld [vmem:[#allocation8 + $0xb8] sm:$0xff]   ;;  %v145_v36 = vlaneseq }
  0x5c   :  { %v146_v37 = vshrl.u32 %v145_v36, 7 }
  0x5d   :  { %504 = vmatpush1.bf16.msra.mxu0 %v1153_v38  ;;  %545 = vmatpush1.bf16.msra.mxu1 %v1154_v39 }
  0x5e   :  { %505 = vmatprep.subr.bf16.mxu0 %v1155_v40  ;;  %546 = vmatprep.subr.bf16.mxu1 %v1157_v41  ;;  %v147_v38 = vsub.s32 0, %v146_v37  ;;  %v155_v39 = vsub.s32 2, %v146_v37  ;;  %v143_v40 = vld [vmem:[%s1420_s3] sm:$0xf]  ;;  %v151_v41 = vsub.s32 1, %v146_v37 }
  0x61   :  { %506 = vmatpush1.bf16.msra.mxu0 %v1159_v42  ;;  %547 = vmatpush1.bf16.msra.mxu1 %v1160_v43  ;;  %v159_v42 = vsub.s32 3, %v146_v37  ;;  %v148_v43 = vrot.slane %v143_v40, %v147_v38 }
  0x62   :  { %507 = vmatprep.subr.bf16.mxu0 %v1161_v44  ;;  %548 = vmatprep.subr.bf16.mxu1 %v1163_v45  ;;  %v156_v44 = vrot.slane %v143_v40, %v155_v39  ;;  %v152_v45 = vrot.slane %v143_v40, %v151_v41 }
  0x65   :  { %508 = vmatpush1.bf16.msra.mxu0 %v1165_v46  ;;  %549 = vmatpush1.bf16.msra.mxu1 %v1166_v47  ;;  %v160_v46 = vrot.slane %v143_v40, %v159_v42 }
  0x66   :  { %509 = vmatprep.subr.bf16.mxu0 %v1167_v49  ;;  %550 = vmatprep.subr.bf16.mxu1 %v1169_v51 }
  0x69   :  { %510 = vmatpush1.bf16.msra.mxu0 %v1171_v52  ;;  %551 = vmatpush1.bf16.msra.mxu1 %v1172_v54 }
  0x6a   :  { %511 = vmatprep.subr.bf16.mxu0 %v1173_v55  ;;  %552 = vmatprep.subr.bf16.mxu1 %v1175_v56 }
  0x6d   :  { %512 = vmatpush1.bf16.msra.mxu0 %v1177_v57  ;;  %553 = vmatpush1.bf16.msra.mxu1 %v1178_v58 }
  0x6e   :  { %513 = vmatprep.subr.bf16.mxu0 %v1179_v59  ;;  %554 = vmatprep.subr.bf16.mxu1 %v1181_v60 }
  0x71   :  { %514 = vmatpush1.bf16.msra.mxu0 %v1183_v61  ;;  %555 = vmatpush1.bf16.msra.mxu1 %v1184_v62 }
  0x72   :  { %515 = vmatprep.subr.bf16.mxu0 %v1185_v63  ;;  %556 = vmatprep.subr.bf16.mxu1 %v1187_v0 }
  0x75   :  { %516 = vmatpush1.bf16.msra.mxu0 %v1189_v1  ;;  %557 = vmatpush1.bf16.msra.mxu1 %v1190_v2 }
  0x76   :  { %1043 = vmatprep.subr.bf16.mxu0 %v1191_v3  ;;  %1065 = vmatprep.subr.bf16.mxu1 %v1192_v4 }
  0x78   :  { %518 = vmatmul.mubr.bf16.vlgmr.msra.gmra.mrb[0].mxu0 %v77_v6  ;;  %559 = vmatmul.mubr.bf16.vlgmr.msra.gmra.mrb[0].mxu1 %v77_v6 }
  0x79   :  { %1044 = vmatpush3.bf16.msra.mxu0 %v1193_v5  ;;  %1066 = vmatpush3.bf16.msra.mxu1 %v1194_v7 }
  0x7a   :  { %1045 = vmatprep.subr.bf16.mxu0 %v1195_v8  ;;  %1067 = vmatprep.subr.bf16.mxu1 %v1196_v9 }
  0x7d   :  { %1046 = vmatpush3.bf16.msra.mxu0 %v1197_v10  ;;  %1068 = vmatpush3.bf16.msra.mxu1 %v1198_v11  ;;  %v1010_v10 = vld [vmem:[%s1422_s5] ss:$0 sm:$0xff] }
  0x7e   :  { %1047 = vmatprep.subr.bf16.mxu0 %v1199_v12  ;;  %1069 = vmatprep.subr.bf16.mxu1 %v1200_v13 }
  0x81   :  { %1048 = vmatpush3.bf16.msra.mxu0 %v1201_v14  ;;  %1070 = vmatpush3.bf16.msra.mxu1 %v1202_v15 }
  0x82   :  { %1049 = vmatprep.subr.bf16.mxu0 %v1203_v16  ;;  %1071 = vmatprep.subr.bf16.mxu1 %v1204_v17 }
  0x85   :  { %1050 = vmatpush3.bf16.msra.mxu0 %v1205_v18  ;;  %1072 = vmatpush3.bf16.msra.mxu1 %v1206_v19 }
  0x86   :  { %1051 = vmatprep.subr.bf16.mxu0 %v1207_v20  ;;  %1073 = vmatprep.subr.bf16.mxu1 %v1208_v21 }
  0x89   :  { %1052 = vmatpush3.bf16.msra.mxu0 %v1209_v22  ;;  %1074 = vmatpush3.bf16.msra.mxu1 %v1210_v23 }
  0x8a   :  { %1053 = vmatprep.subr.bf16.mxu0 %v1211_v24  ;;  %1075 = vmatprep.subr.bf16.mxu1 %v1212_v25 }
  0x8d   :  { %1054 = vmatpush3.bf16.msra.mxu0 %v1213_v26  ;;  %1076 = vmatpush3.bf16.msra.mxu1 %v1214_v27 }
  0x8e   :  { %1055 = vmatprep.subr.bf16.mxu0 %v1215_v28  ;;  %1077 = vmatprep.subr.bf16.mxu1 %v1216_v29 }
  0x91   :  { %1056 = vmatpush3.bf16.msra.mxu0 %v1217_v30  ;;  %1078 = vmatpush3.bf16.msra.mxu1 %v1218_v31 }
  0x92   :  { %1057 = vmatprep.subr.bf16.mxu0 %v1219_v32  ;;  %1079 = vmatprep.subr.bf16.mxu1 %v1220_v33 }
  0x95   :  { %1058 = vmatpush3.bf16.msra.mxu0 %v1221_v34  ;;  %1080 = vmatpush3.bf16.msra.mxu1 %v1222_v35 }
 0x14b   :  { %v519_v47 = vpop.f32.mrb[0].mxu0  ;;  %v560_v49 = vpop.f32.mrb[0].mxu1 }
 0x14c   :  { %v520_v50 = vadd.f32 %v519_v47, %v148_v43  ;;  %v561_v51 = vadd.f32 %v560_v49, %v156_v44  ;;  %v521_v52 = vpop.f32.mrb[1].mxu0  ;;  %v562_v53 = vpop.f32.mrb[1].mxu1 }
 0x14d   :  { %v522_v54 = vadd.f32 %v521_v52, %v152_v45  ;;  %v563_v55 = vadd.f32 %v562_v53, %v160_v46  ;;  %v523_v56 = vpop.f32.mrb[2].mxu0  ;;  %v564_v57 = vpop.f32.mrb[2].mxu1 }
 0x14e   :  { %vm568_vm0 = vcmp.gt.f32.partialorder %v520_v50, 0.0  ;;  %v573_v58 = vmul.f32 %v572_v48, %v520_v50  ;;  %vm570_vm1 = vcmp.gt.f32.partialorder %v561_v51, 0.0  ;;  %v575_v59 = vmul.f32 %v572_v48, %v561_v51  ;;  %v524_v60 = vpop.f32.mrb[3].mxu0  ;;  %v565_v61 = vpop.f32.mrb[3].mxu1 }
 0x14f   :  { %vm569_vm2 = vcmp.gt.f32.partialorder %v522_v54, 0.0  ;;  %v574_v62 = vmul.f32 %v572_v48, %v522_v54  ;;  %vm571_vm3 = vcmp.gt.f32.partialorder %v563_v55, 0.0  ;;  %v576_v63 = vmul.f32 %v572_v48, %v563_v55 }
 0x150   :  { %v577_v0 = vsel %vm568_vm0, %v520_v50, %v573_v58  ;;  %v579_v1 = vsel %vm570_vm1, %v561_v51, %v575_v59 }
 0x151   :  { %v578_v2 = vsel %vm569_vm2, %v522_v54, %v574_v62  ;;  %v580_v3 = vsel %vm571_vm3, %v563_v55, %v576_v63  ;;  %v581_v6 = vpack.c.bf16 %v577_v0, %v577_v0  ;;  %v583_v7 = vpack.c.bf16 %v579_v1, %v579_v1 }
 0x152   :  { %v582_v4 = vpack.c.bf16 %v578_v2, %v578_v2  ;;  %v584_v5 = vpack.c.bf16 %v580_v3, %v580_v3 }
 0x154   :  { %880 = vmatprep.mubr.bf16.mxu0 %v582_v4  ;;  %920 = vmatprep.mubr.bf16.mxu1 %v584_v5 }
 0x155   :  { %881 = vmatmul.mubr.bf16.vlgmr.msra.gmra.mrb[4].mxu0 %v581_v6  ;;  %921 = vmatmul.mubr.bf16.vlgmr.msra.gmra.mrb[4].mxu1 %v583_v7 }
 0x228   :  { %v1059_v8 = vpop.f32.mrb[4].mxu0  ;;  %v1081_v9 = vpop.f32.mrb[4].mxu1 }
 0x229   :  { %v1060_v11 = vpop.f32.mrb[5].mxu0  ;;  %v1082_v12 = vpop.f32.mrb[5].mxu1 }
 0x22a   :  { %v1061_v13 = vadd.f32 %v1060_v11, %v1059_v8  ;;  %v1083_v14 = vadd.f32 %v1082_v12, %v1081_v9  ;;  %v1062_v15 = vpop.f32.mrb[6].mxu0  ;;  %v1084_v16 = vpop.f32.mrb[6].mxu1 }
 0x22b   :  { %v1063_v17 = vpop.f32.mrb[7].mxu0  ;;  %v1085_v18 = vpop.f32.mrb[7].mxu1 }
 0x22c   :  { %v883_v19 = vadd.f32 %v1061_v13, %v1010_v10 }
 0x22e   :  { %v923_v20 = vadd.f32 %v1083_v14, %v883_v19 }
 0x230   :  { %928 = vst [vmem:[#allocation9] sm:$0x3] %v923_v20 }
 0x231   :  { %1300 = shalt.err (!%p1297_p0)
}
 0x232   :  { %s1301_s18 = scalar_lea.hbm %s1423_s6, 32 }
 0x233   :  { %p1302_p1 = scmp.ne.s32.totalorder %s1423_s6, %s1301_s18  ;;  %p1305_p2 = scmp.lt.u32.totalorder %s1301_s18, %s1423_s6 }
 0x235   :  { %p1307_p3 = pnand %p1305_p2, %p1302_p1 }
 0x237   :  { %1310 = shalt.err (!%p1307_p3)
}
 0x238   :  { %938 = dma.vmem_to_hbm [thread:$0]  %s936_s15, 32, %s1423_s6, [#allocation5]  }
 0x239   :  { %1315 = dma.done.wait [#allocation5], 32  }
 0x23a   :  { %1316 = vsyncadd [#allocation5], 4294967264 }
 0x23b   :  { %942 = vsyncpa [#allocation4], 1 }
 0x23c   :  { %943 = vsyncpa [#allocation7], 1 }
 0x23d   :  { %944 = vsyncpa [#allocation5], 1 }

</bundles_post_ra>
